<compile_context>
chip_gen: v7x
topology: tpu7x:2x2x1
jax: 0.10.0
libtpu: 0.0.40
codegen_flags: <defaults>
</compile_context>

<pallas_src>
import functools
import math

import jax
import jax.numpy as jnp
from jax.experimental import pallas as pl
from jax.experimental.pallas import tpu as pltpu


NEG_INF = -1e30  # finite "-inf": keeps softmax NaN-free even for fully-masked rows


def _tile(dim, target, align):
    """Largest tile <= target that is a multiple of `align` and divides `dim`.
    Falls back to the full dim (a full-extent block is always legal)."""
    if dim <= target:
        return dim
    t = (target // align) * align
    while t >= align:
        if dim % t == 0:
            return t
        t -= align
    return dim


# ----------------------------------------------------------------------------
# Tiled linear:  y = x @ w + b   (optionally GELU)
# ----------------------------------------------------------------------------
def _linear_kernel(x_ref, w_ref, b_ref, o_ref, acc_ref, *, activation, n_k):
    @pl.when(pl.program_id(2) == 0)
    def _():
        acc_ref[...] = jnp.zeros_like(acc_ref)

    # bf16 operands, f32 accumulation on the MXU.
    x = x_ref[...].astype(jnp.bfloat16)
    w = w_ref[...]                              # stored bf16
    acc_ref[...] += jnp.dot(x, w, preferred_element_type=jnp.float32)

    @pl.when(pl.program_id(2) == n_k - 1)
    def _():
        y = acc_ref[...] + b_ref[...]
        if activation == "gelu":
            # exact (erf) GELU — matches torch nn.GELU() default
            y = 0.5 * y * (1.0 + jax.lax.erf(y * 0.7071067811865476))
        o_ref[...] = y.astype(o_ref.dtype)


def pallas_linear(x2d, w, b, activation=None, *, tm=256, tn=256, tk=512):
    """x2d: (M, K) f32; w: (K, N) bf16; b: (N,) f32 -> (M, N) f32."""
    M, K = x2d.shape
    N = w.shape[1]
    tm = _tile(M, tm, 8)      # sublane dim of f32 x / out
    tn = _tile(N, tn, 128)    # lane dim of w / bias / out
    tk = _tile(K, tk, 128)    # lane dim of x, sublane of bf16 w
    n_k = K // tk
    return pl.pallas_call(
        functools.partial(_linear_kernel, activation=activation, n_k=n_k),
        out_shape=jax.ShapeDtypeStruct((M, N), jnp.float32),
        grid=(M // tm, N // tn, n_k),
        in_specs=[
            pl.BlockSpec((tm, tk), lambda i, j, k: (i, k)),
            pl.BlockSpec((tk, tn), lambda i, j, k: (k, j)),
            pl.BlockSpec((1, tn), lambda i, j, k: (0, j)),
        ],
        out_specs=pl.BlockSpec((tm, tn), lambda i, j, k: (i, j)),
        scratch_shapes=[pltpu.VMEM((tm, tn), jnp.float32)],
        compiler_params=pltpu.CompilerParams(
            dimension_semantics=("parallel", "parallel", "arbitrary")),
    )(x2d, w, b.reshape(1, N))


# ----------------------------------------------------------------------------
# Row-tiled LayerNorm (optionally fused with a residual add)
# ----------------------------------------------------------------------------
def _ln_core(x, g, b):
    mean = jnp.mean(x, axis=-1, keepdims=True)
    var = jnp.mean((x - mean) ** 2, axis=-1, keepdims=True)   # biased (torch LN)
    return (x - mean) * jax.lax.rsqrt(var + 1e-5) * g + b


def _layernorm_kernel(x_ref, g_ref, b_ref, o_ref):
    x = x_ref[...].astype(jnp.float32)
    o_ref[...] = _ln_core(x, g_ref[...], b_ref[...]).astype(o_ref.dtype)


def _layernorm_residual_kernel(x_ref, r_ref, g_ref, b_ref, o_ref):
    x = x_ref[...].astype(jnp.float32) + r_ref[...].astype(jnp.float32)
    o_ref[...] = _ln_core(x, g_ref[...], b_ref[...]).astype(o_ref.dtype)


def pallas_layernorm(x2d, gamma, beta, residual=None, *, tm=512):
    """LayerNorm over the last dim (eps=1e-5). If residual is given, computes
    LN(x + residual) — the residual add never round-trips HBM separately."""
    M, D = x2d.shape
    tm = _tile(M, tm, 8)
    row_spec = pl.BlockSpec((tm, D), lambda i: (i, 0))
    vec_spec = pl.BlockSpec((1, D), lambda i: (0, 0))
    g2, b2 = gamma.reshape(1, D), beta.reshape(1, D)
    if residual is None:
        kernel, in_specs, args = _layernorm_kernel, [row_spec, vec_spec, vec_spec], (x2d, g2, b2)
    else:
        kernel = _layernorm_residual_kernel
        in_specs = [row_spec, row_spec, vec_spec, vec_spec]
        args = (x2d, residual, g2, b2)
    return pl.pallas_call(
        kernel,
        out_shape=jax.ShapeDtypeStruct((M, D), jnp.float32),
        grid=(M // tm,),
        in_specs=in_specs,
        out_specs=row_spec,
        compiler_params=pltpu.CompilerParams(dimension_semantics=("parallel",)),
    )(*args)


# ----------------------------------------------------------------------------
# Flash-style attention: causal mask generated in-kernel, online softmax
# ----------------------------------------------------------------------------
def _flash_attn_kernel(pad_ref, q_ref, k_ref, v_ref, o_ref,
                       m_ref, l_ref, acc_ref, *, scale, tq, tkv):
    qi = pl.program_id(1)
    ki = pl.program_id(2)
    n_kv = pl.num_programs(2)

    @pl.when(ki == 0)
    def _():
        m_ref[...] = jnp.full_like(m_ref, NEG_INF)
        l_ref[...] = jnp.zeros_like(l_ref)
        acc_ref[...] = jnp.zeros_like(acc_ref)

    # Skip kv tiles that are entirely above the causal diagonal.
    @pl.when(ki * tkv <= qi * tq + (tq - 1))
    def _():
        q = q_ref[0].astype(jnp.bfloat16)                   # (tq, Dh)
        k = k_ref[0].astype(jnp.bfloat16)                   # (tkv, Dh)
        s = jnp.dot(q, k.T, preferred_element_type=jnp.float32) * scale  # (tq, tkv) f32

        # causal + key-padding mask built on the VPU — nothing streamed from HBM
        row = qi * tq + jax.lax.broadcasted_iota(jnp.int32, (tq, tkv), 0)
        col = ki * tkv + jax.lax.broadcasted_iota(jnp.int32, (tq, tkv), 1)
        s = jnp.where(col <= row, s, NEG_INF)
        s = s + pad_ref[0]                                  # (1, tkv) additive pad mask

        m_prev = m_ref[...]
        m_new = jnp.maximum(m_prev, jnp.max(s, axis=-1, keepdims=True))
        alpha = jnp.exp(m_prev - m_new)
        p = jnp.exp(s - m_new)
        l_ref[...] = alpha * l_ref[...] + jnp.sum(p, axis=-1, keepdims=True)
        acc_ref[...] = alpha * acc_ref[...] + jnp.dot(
            p.astype(jnp.bfloat16), v_ref[0].astype(jnp.bfloat16),
            preferred_element_type=jnp.float32)
        m_ref[...] = m_new

    @pl.when(ki == n_kv - 1)
    def _():
        inv = pl.reciprocal(l_ref[...], approx=True)        # EUP, folded into epilogue
        o_ref[0] = (acc_ref[...] * inv).astype(o_ref.dtype)


def pallas_flash_attention(q, k, v, pad_add, n_heads, *, tq=256, tkv=256):
    """q,k,v: (B*H, L, Dh) f32; pad_add: (B, 1, L) additive f32 (0 / -1e30)."""
    BH, L, Dh = q.shape
    H = n_heads
    scale = 1.0 / math.sqrt(Dh)
    tq = _tile(L, tq, 8)
    tkv = _tile(L, tkv, 128)
    return pl.pallas_call(
        functools.partial(_flash_attn_kernel, scale=scale, tq=tq, tkv=tkv),
        out_shape=jax.ShapeDtypeStruct((BH, L, Dh), jnp.float32),
        grid=(BH, L // tq, L // tkv),
        in_specs=[
            pl.BlockSpec((1, 1, tkv), lambda bh, qi, ki: (bh // H, 0, ki)),
            pl.BlockSpec((1, tq, Dh), lambda bh, qi, ki: (bh, qi, 0)),
            pl.BlockSpec((1, tkv, Dh), lambda bh, qi, ki: (bh, ki, 0)),
            pl.BlockSpec((1, tkv, Dh), lambda bh, qi, ki: (bh, ki, 0)),
        ],
        out_specs=pl.BlockSpec((1, tq, Dh), lambda bh, qi, ki: (bh, qi, 0)),
        scratch_shapes=[
            pltpu.VMEM((tq, 1), jnp.float32),     # running max
            pltpu.VMEM((tq, 1), jnp.float32),     # running denom
            pltpu.VMEM((tq, Dh), jnp.float32),    # accumulator
        ],
        compiler_params=pltpu.CompilerParams(
            dimension_semantics=("parallel", "parallel", "arbitrary")),
    )(pad_add, q, k, v)


# ----------------------------------------------------------------------------
# Model glue (plain JAX)
# ----------------------------------------------------------------------------
def sinusoidal_pe(max_len, d_model):
    pos = jnp.arange(max_len, dtype=jnp.float32)[:, None]
    div = jnp.exp(
        jnp.arange(0, d_model, 2, dtype=jnp.float32) * -(math.log(10000.0) / d_model)
    )
    pe = jnp.zeros((max_len, d_model), jnp.float32)
    pe = pe.at[:, 0::2].set(jnp.sin(pos * div))
    pe = pe.at[:, 1::2].set(jnp.cos(pos * div))
    return pe


def init_params(key, vocab_size, d_model, n_layers, n_heads, max_len=2048):
    keys = jax.random.split(key, 2 + n_layers)
    bf = jnp.bfloat16
    params = {
        "embed": jax.random.normal(keys[0], (vocab_size, d_model), jnp.float32) * 0.02,
        "pe": sinusoidal_pe(max_len, d_model),
        "ln_g": jnp.ones((d_model,), jnp.float32),
        "ln_b": jnp.zeros((d_model,), jnp.float32),
        # matmul weights stored transposed (x @ w) and in bf16 (f32 accumulation)
        "out_w": (jax.random.normal(keys[1], (d_model, vocab_size), jnp.float32) * 0.02).astype(bf),
        "out_b": jnp.zeros((vocab_size,), jnp.float32),
        "blocks": [],
    }
    D = d_model
    for li in range(n_layers):
        k = jax.random.split(keys[2 + li], 4)
        params["blocks"].append({
            "in_w": (jax.random.normal(k[0], (D, 3 * D), jnp.float32) * 0.02).astype(bf),
            "in_b": jnp.zeros((3 * D,), jnp.float32),
            "attn_out_w": (jax.random.normal(k[1], (D, D), jnp.float32) * 0.02).astype(bf),
            "attn_out_b": jnp.zeros((D,), jnp.float32),
            "ln1_g": jnp.ones((D,), jnp.float32),
            "ln1_b": jnp.zeros((D,), jnp.float32),
            "ln2_g": jnp.ones((D,), jnp.float32),
            "ln2_b": jnp.zeros((D,), jnp.float32),
            "ff1_w": (jax.random.normal(k[2], (D, 4 * D), jnp.float32) * 0.02).astype(bf),
            "ff1_b": jnp.zeros((4 * D,), jnp.float32),
            "ff2_w": (jax.random.normal(k[3], (4 * D, D), jnp.float32) * 0.02).astype(bf),
            "ff2_b": jnp.zeros((D,), jnp.float32),
        })
    return params


def decoder_block(x, p, pad_add, H):
    """x: (B, L, D); pad_add: (B, 1, L) additive pad mask (0 / -1e30)."""
    B, L, D = x.shape
    Dh = D // H
    x2 = x.reshape(B * L, D)

    # QKV projection (q/k/v chunks along the output dim, same as torch in_proj)
    qkv = pallas_linear(x2, p["in_w"], p["in_b"])            # (B*L, 3D)
    qkv = qkv.reshape(B, L, 3, H, Dh)
    # TODO(synk): fuse the head split into the QKV out_spec (or fuse QKV+attention)
    #             to remove these XLA transposes (one HBM round trip each).
    q = qkv[:, :, 0].transpose(0, 2, 1, 3).reshape(B * H, L, Dh)
    k = qkv[:, :, 1].transpose(0, 2, 1, 3).reshape(B * H, L, Dh)
    v = qkv[:, :, 2].transpose(0, 2, 1, 3).reshape(B * H, L, Dh)

    attn = pallas_flash_attention(q, k, v, pad_add, H)        # (B*H, L, Dh)
    attn = attn.reshape(B, H, L, Dh).transpose(0, 2, 1, 3).reshape(B * L, D)
    attn_out = pallas_linear(attn, p["attn_out_w"], p["attn_out_b"])

    # dropout == identity (eval); residual adds fused into the LN kernels
    x2 = pallas_layernorm(x2, p["ln1_g"], p["ln1_b"], residual=attn_out)

    h = pallas_linear(x2, p["ff1_w"], p["ff1_b"], activation="gelu")
    h = pallas_linear(h, p["ff2_w"], p["ff2_b"])
    x2 = pallas_layernorm(x2, p["ln2_g"], p["ln2_b"], residual=h)
    return x2.reshape(B, L, D)


def synphony_forward(params, tokens, n_heads, pad_mask=None):
    """tokens: (B, L) int32; pad_mask: optional (B, L) bool (True = keep)."""
    B, L = tokens.shape
    D = params["embed"].shape[1]

    # embedding + positional encoding (glue)
    x = jnp.take(params["embed"], tokens, axis=0) + params["pe"][:L][None]

    # only the tiny (B, 1, L) additive pad mask is materialized; the causal
    # mask is generated inside the attention kernel.
    if pad_mask is not None:
        pad_add = jnp.where(pad_mask, 0.0, NEG_INF).astype(jnp.float32).reshape(B, 1, L)
    else:
        pad_add = jnp.zeros((B, 1, L), jnp.float32)

    for blk in params["blocks"]:
        x = decoder_block(x, blk, pad_add, n_heads)

    x2 = pallas_layernorm(x.reshape(B * L, D), params["ln_g"], params["ln_b"])
    # logits projection: vocab tiled (tn=512), K-loop over d_model
    logits = pallas_linear(x2, params["out_w"], params["out_b"], tn=512)
    return logits.reshape(B, L, -1)


# ----------------------------------------------------------------------------
# Demo
# ----------------------------------------------------------------------------
if __name__ == "__main__":
    VOCAB, D_MODEL, N_LAYERS, N_HEADS = 50, 32, 2, 4
    B, L = 2, 8

    key = jax.random.PRNGKey(0)
    kp, kt = jax.random.split(key)
    params = init_params(kp, VOCAB, D_MODEL, N_LAYERS, N_HEADS)

    tokens = jax.random.randint(kt, (B, L), 0, VOCAB, dtype=jnp.int32)
    # pad_mask: True = valid token; last position of sample 1 is padding
    pad_mask = jnp.ones((B, L), dtype=bool).at[1, L - 1].set(False)

    logits = synphony_forward(params, tokens, N_HEADS, pad_mask=pad_mask)
    logits = jax.block_until_ready(logits)

    assert logits.shape == (B, L, VOCAB)
    assert bool(jnp.all(jnp.isfinite(logits)))
    print("KERNEL_OK")
</pallas_src>

<mosaic_0001>
module attributes {stable_mosaic.version = 11 : i64} {
  func.func @_linear_kernel(%arg0: i32, %arg1: i32, %arg2: i32, %arg3: memref<16x32xf32, #tpu.memory_space<vmem>>, %arg4: memref<32x96xbf16, #tpu.memory_space<vmem>>, %arg5: memref<1x96xf32, #tpu.memory_space<vmem>>, %arg6: memref<16x96xf32, #tpu.memory_space<vmem>>, %arg7: memref<16x96xf32, #tpu.memory_space<vmem>>) attributes {dimension_semantics = [#tpu.dimension_semantics<parallel>, #tpu.dimension_semantics<parallel>, #tpu.dimension_semantics<arbitrary>], iteration_bounds = array<i64: 1, 1, 1>, scalar_prefetch = 0 : i64, scratch_operands = 1 : i64, tpu.core_type = #tpu.core_type<tc>, window_params = [{transform_indices = @transform_0, window_bounds = array<i64: 16, 32>}, {transform_indices = @transform_1, window_bounds = array<i64: 32, 96>}, {transform_indices = @transform_2, window_bounds = array<i64: 1, 96>}, {transform_indices = @transform_3, window_bounds = array<i64: 16, 96>}]} {
    %c0_i32 = arith.constant 0 : i32
    %0 = arith.cmpi eq, %arg2, %c0_i32 : i32
    %1 = arith.extui %0 : i1 to i32
    %c0_i32_0 = arith.constant 0 : i32
    %2 = arith.cmpi ne, %1, %c0_i32_0 : i32
    scf.if %2 {
      %cst_10 = arith.constant 0.000000e+00 : f32
      %13 = vector.broadcast %cst_10 : f32 to vector<16x96xf32>
      %c0_11 = arith.constant 0 : index
      %c0_12 = arith.constant 0 : index
      %14 = vector.load %arg7[%c0_11, %c0_12] : memref<16x96xf32, #tpu.memory_space<vmem>>, vector<16x96xf32>
      tpu.vector_store %arg7[%c0_11, %c0_12], %13 {strides = array<i32>} : memref<16x96xf32, #tpu.memory_space<vmem>>, vector<16x96xf32>,
    } else {
    }
    %c0 = arith.constant 0 : index
    %c0_1 = arith.constant 0 : index
    %3 = vector.load %arg3[%c0, %c0_1] : memref<16x32xf32, #tpu.memory_space<vmem>>, vector<16x32xf32>
    %4 = arith.truncf %3 : vector<16x32xf32> to vector<16x32xbf16>
    %c0_2 = arith.constant 0 : index
    %c0_3 = arith.constant 0 : index
    %5 = vector.load %arg4[%c0_2, %c0_3] : memref<32x96xbf16, #tpu.memory_space<vmem>>, vector<32x96xbf16>
    %c0_4 = arith.constant 0 : index
    %c0_5 = arith.constant 0 : index
    %6 = vector.load %arg7[%c0_4, %c0_5] : memref<16x96xf32, #tpu.memory_space<vmem>>, vector<16x96xf32>
    %cst = arith.constant dense<0.000000e+00> : vector<16x96xf32>
    %7 = tpu.matmul %4, %5, %cst {dimension_numbers = #tpu.dot_dimension_numbers<[1], [0], [0], [1], [0, 0, 1, 1], [], []>} : vector<16x32xbf16>, vector<32x96xbf16>, vector<16x96xf32> -> vector<16x96xf32>
    %8 = arith.addf %6, %7 : vector<16x96xf32>
    %c0_6 = arith.constant 0 : index
    %c0_7 = arith.constant 0 : index
    %9 = vector.load %arg7[%c0_6, %c0_7] : memref<16x96xf32, #tpu.memory_space<vmem>>, vector<16x96xf32>
    tpu.vector_store %arg7[%c0_6, %c0_7], %8 {strides = array<i32>} : memref<16x96xf32, #tpu.memory_space<vmem>>, vector<16x96xf32>,
    %c0_i32_8 = arith.constant 0 : i32
    %10 = arith.cmpi eq, %arg2, %c0_i32_8 : i32
    %11 = arith.extui %10 : i1 to i32
    %c0_i32_9 = arith.constant 0 : i32
    %12 = arith.cmpi ne, %11, %c0_i32_9 : i32
    scf.if %12 {
      %c0_10 = arith.constant 0 : index
      %c0_11 = arith.constant 0 : index
      %13 = vector.load %arg7[%c0_10, %c0_11] : memref<16x96xf32, #tpu.memory_space<vmem>>, vector<16x96xf32>
      %c0_12 = arith.constant 0 : index
      %c0_13 = arith.constant 0 : index
      %14 = vector.load %arg5[%c0_12, %c0_13] : memref<1x96xf32, #tpu.memory_space<vmem>>, vector<1x96xf32>
      %15 = vector.broadcast %14 : vector<1x96xf32> to vector<16x96xf32>
      %16 = arith.addf %13, %15 : vector<16x96xf32>
      %c0_14 = arith.constant 0 : index
      %c0_15 = arith.constant 0 : index
      %17 = vector.load %arg6[%c0_14, %c0_15] : memref<16x96xf32, #tpu.memory_space<vmem>>, vector<16x96xf32>
      tpu.vector_store %arg6[%c0_14, %c0_15], %16 {strides = array<i32>} : memref<16x96xf32, #tpu.memory_space<vmem>>, vector<16x96xf32>,
    } else {
    }
    return
  }
  func.func @transform_0(%arg0: i32, %arg1: i32, %arg2: i32) -> (i32, i32) {
    %c0_i32 = arith.constant 0 : i32
    return %arg0, %arg2 : i32, i32
  }
  func.func @transform_1(%arg0: i32, %arg1: i32, %arg2: i32) -> (i32, i32) {
    %c0_i32 = arith.constant 0 : i32
    return %arg2, %arg1 : i32, i32
  }
  func.func @transform_2(%arg0: i32, %arg1: i32, %arg2: i32) -> (i32, i32) {
    %c0_i32 = arith.constant 0 : i32
    %c0_i32_0 = arith.constant 0 : i32
    return %c0_i32, %arg1 : i32, i32
  }
  func.func @transform_3(%arg0: i32, %arg1: i32, %arg2: i32) -> (i32, i32) {
    %c0_i32 = arith.constant 0 : i32
    return %arg0, %arg1 : i32, i32
  }
}

</mosaic_0001>

<bundles_post_ra>
// kernel: tpu_custom_call.1
= control target key start
LH: loop header
LB: loop body
LE: loop exit
PB: predicated region body
PF: predicated region fallthrough
CT: control target
= control target key end

     0   :  { %8 = vsyncpa [#allocation4], 0  ;;  %s334_s0 = inlined_call_operand.hbm [shape: f32[16,32], index: 0, kind: input, shape index: {}]   ;;  %s335_s1 = inlined_call_operand.hbm [shape: bf16[32,96], index: 1, kind: input, shape index: {}]   ;;  %s336_s2 = inlined_call_operand.vmem [shape: f32[1,96], index: 2, kind: input, shape index: {}]   ;;  %s337_s3 = inlined_call_operand.hbm [shape: f32[16,96], index: 3, kind: output, shape index: {}]  }
   0x1   :  { %9 = vsyncpa [#allocation7], 0 }
   0x2   :  { %10 = vsyncpa [#allocation5], 0  ;;  %s254_s12 = smov [#allocation3]   ;;  %s182_s16 = scalar_lea.hbm %s334_s0, 256 }
   0x3   :  { %s16_s13 = sshll.u32 %s254_s12, 4  ;;  %p183_p0 = scmp.ne.s32.totalorder %s334_s0, %s182_s16  ;;  %s17_s13 = int_to_ptr.vmem [resolvable:$true] %s16_s13 }
   0x4   :  { %p186_p1 = scmp.lt.u32.totalorder %s182_s16, %s334_s0 }
   0x6   :  { %p188_p2 = pnand %p186_p1, %p183_p0 }
   0x8   :  { %191 = shalt.err (!%p188_p2)
}
   0x9   :  { %s192_s21 = scalar_lea.vmem %s17_s13, 256  ;;  %p197_p4 = scmp.lt.s32.totalorder %s17_s13, %s17_s13 }
   0xa   :  { %p193_p3 = scmp.ne.s32.totalorder %s17_s13, %s192_s21  ;;  %p198_p5 = scmp.lt.s32.totalorder %s192_s21, %s192_s21 }
   0xc   :  { %p199_p6 = por %p198_p5, %p197_p4 }
   0xe   :  { %p200_p7 = pnand %p199_p6, %p193_p3 }
  0x10   :  { %203 = shalt.err (!%p200_p7)
}
  0x11   :  { %s255_s22 = smov 128   ;;  %s256_s23 = smov 8  }
  0x12   :  { %22 = dma.hbm_to_vmem [thread:$0]  %s334_s0, 256, %s17_s13, [#allocation4], %s255_s22, %s255_s22, %s256_s23  }
  0x13   :  { %s257_s26 = smov [#allocation6]   ;;  %s204_s30 = scalar_lea.hbm %s335_s1, 256 }
  0x14   :  { %s28_s27 = sshll.u32 %s257_s26, 4  ;;  %p205_p8 = scmp.ne.s32.totalorder %s335_s1, %s204_s30  ;;  %s29_s27 = int_to_ptr.vmem [resolvable:$true] %s28_s27 }
  0x15   :  { %p208_p9 = scmp.lt.u32.totalorder %s204_s30, %s335_s1 }
  0x17   :  { %p210_p10 = pnand %p208_p9, %p205_p8 }
  0x19   :  { %213 = shalt.err (!%p210_p10)
}
  0x1a   :  { %s214_s8 = scalar_lea.vmem %s29_s27, 256  ;;  %p219_p12 = scmp.lt.s32.totalorder %s29_s27, %s29_s27 }
  0x1b   :  { %p215_p11 = scmp.ne.s32.totalorder %s29_s27, %s214_s8  ;;  %p220_p13 = scmp.lt.s32.totalorder %s214_s8, %s214_s8 }
  0x1d   :  { %p221_p0 = por %p220_p13, %p219_p12 }
  0x1f   :  { %p222_p1 = pnand %p221_p0, %p215_p11 }
  0x21   :  { %225 = shalt.err (!%p222_p1)
}
  0x22   :  { %s258_s0 = smov 64   ;;  %s259_s9 = smov 4  }
  0x23   :  { %34 = dma.hbm_to_vmem [thread:$0]  %s335_s1, 256, %s29_s27, [#allocation7], %s258_s0, %s258_s0, %s259_s9  }
  0x24   :  { %248 = dma.done.wait [#allocation4], 256  }
  0x25   :  { %249 = vsyncadd [#allocation4], 4294967040 }
  0x26   :  { %250 = dma.done.wait [#allocation7], 256  }
  0x27   :  { %251 = vsyncadd [#allocation7], 4294967040  ;;  %vm48_vm0 = vcmask 785408   ;;  %v260_v0 = vmov 0.0   ;;  %vm261_vm1 = vmmov 0   ;;  %v180_v1 = vld [vmem:[#allocation6] sm:$0xff]  }
  0x28   :  { %49 = vst.msk [vmem:[#allocation2] sm:$0xff] %vm48_vm0, %v260_v0  ;;  %50 = vst.msk [vmem:[#allocation2 + $0x8] sm:$0xff] %vm48_vm0, %v260_v0  ;;  %163 = vmatprep.subr.bf16.mxu0 %v260_v0  ;;  %167 = vmatprep.mubr.msk.bf16.mxu0 %vm261_vm1, %v260_v0  ;;  %v181_v2 = vld [vmem:[#allocation6 + $0x8] sm:$0xff]   ;;  %v51_v3 = vld [vmem:[#allocation3] sm:$0xff]  ;;  %vm72_vm2 = vcmask 261120   ;;  %s262_s13 = smov [#allocation8]  }
  0x29   :  { %164 = vmatpush3.bf16.msra.mxu0 %v180_v1  ;;  %v52_v4 = vld [vmem:[#allocation3 + $0x8] sm:$0xff]  ;;  %v159_v14 = vld [vmem:[%s336_s2] ss:$0 sm:$0xff]  ;;  %s143_s14 = sshll.u32 %s262_s13, 4  ;;  %s144_s14 = int_to_ptr.vmem [resolvable:$true] %s143_s14 }
  0x2a   :  { %165 = vmatprep.subr.bf16.mxu0 %v260_v0  ;;  %v53_v5 = vpack.c.bf16 %v52_v4, %v51_v3  ;;  %s226_s15 = scalar_lea.vmem %s144_s14, 256  ;;  %p231_p3 = scmp.lt.s32.totalorder %s144_s14, %s144_s14 }
  0x2b   :  { %p227_p2 = scmp.ne.s32.totalorder %s144_s14, %s226_s15  ;;  %p232_p4 = scmp.lt.s32.totalorder %s226_s15, %s226_s15 }
  0x2d   :  { %166 = vmatpush3.bf16.msra.mxu0 %v181_v2  ;;  %p233_p5 = por %p232_p4, %p231_p3 }
  0x2f   :  { %v58_v6 = vld [vmem:[#allocation2] sm:$0xff]  ;;  %v59_v8 = vld [vmem:[#allocation2 + $0x8] sm:$0xff]  ;;  %p234_p6 = pnand %p233_p5, %p227_p2 }
  0x30   :  { %168 = vmatmul.mubr.msk.bf16.vlgmr.msra.gmra.mrb[0].mxu0 %vm72_vm2, %v53_v5 }
 0x103   :  { %v110_v7 = vpop.f32.mrb[0].mxu0 }
 0x104   :  { %v117_v9 = vadd.f32 %v110_v7, %v58_v6  ;;  %v169_v10 = vpop.f32.mrb[1].mxu0 }
 0x105   :  { %v113_v11 = vpop.f32.mrb[2].mxu0 }
 0x106   :  { %120 = vst.msk [vmem:[#allocation2] sm:$0xff] %vm48_vm0, %v117_v9  ;;  %v118_v12 = vadd.f32 %v113_v11, %v59_v8  ;;  %v170_v13 = vpop.f32.mrb[3].mxu0 }
 0x108   :  { %121 = vst.msk [vmem:[#allocation2 + $0x8] sm:$0xff] %vm48_vm0, %v118_v12 }
 0x10d   :  { %v125_v15 = vld [vmem:[#allocation2] sm:$0xff] }
 0x10e   :  { %v134_v16 = vadd.f32 %v159_v14, %v125_v15 }
 0x10f   :  { %v126_v17 = vld [vmem:[#allocation2 + $0x8] sm:$0xff] }
 0x110   :  { %v135_v18 = vadd.f32 %v159_v14, %v126_v17  ;;  %136 = vst.msk [vmem:[#allocation8] sm:$0xff] %vm48_vm0, %v134_v16 }
 0x112   :  { %137 = vst.msk [vmem:[#allocation8 + $0x8] sm:$0xff] %vm48_vm0, %v135_v18 }
 0x113   :  { %237 = shalt.err (!%p234_p6)
}
 0x114   :  { %s238_s17 = scalar_lea.hbm %s337_s3, 256 }
 0x115   :  { %p239_p7 = scmp.ne.s32.totalorder %s337_s3, %s238_s17  ;;  %p242_p8 = scmp.lt.u32.totalorder %s238_s17, %s337_s3 }
 0x117   :  { %p244_p9 = pnand %p242_p8, %p239_p7 }
 0x119   :  { %247 = shalt.err (!%p244_p9)
}
 0x11a   :  { %149 = dma.vmem_to_hbm [thread:$0]  %s144_s14, 256, %s337_s3, [#allocation5], %s255_s22, %s255_s22, %s256_s23  }
 0x11b   :  { %252 = dma.done.wait [#allocation5], 256  }
 0x11c   :  { %253 = vsyncadd [#allocation5], 4294967040 }
 0x11d   :  { %153 = vsyncpa [#allocation4], 1 }
 0x11e   :  { %154 = vsyncpa [#allocation7], 1 }
 0x11f   :  { %155 = vsyncpa [#allocation5], 1 }

</bundles_post_ra>
